<compile_context>
chip_gen: v5e
topology: v5e:2x2
jax: 0.10.0
libtpu: 0.0.40
codegen_flags: <defaults>
</compile_context>

<pallas_src>
import functools

import jax
import jax.numpy as jnp
from jax.experimental import pallas as pl
from jax.experimental.pallas import tpu as pltpu


def _round_up(x, m):
    return ((x + m - 1) // m) * m


def _mlp_kernel(x_ref, w1_ref, b1_ref, w2_ref, b2_ref, o_ref):
    # Two chained MXU matmuls, fully fused in VMEM.
    # bf16 operands -> f32 accumulation; bias adds / casts in f32 (v5e-safe).
    x = x_ref[...]                                                   # (tm, in_p) bf16
    h = jnp.dot(x, w1_ref[...], preferred_element_type=jnp.float32)  # (tm, hid_p) f32
    h = h + b1_ref[...]
    h_bf = h.astype(jnp.bfloat16)
    y = jnp.dot(h_bf, w2_ref[...], preferred_element_type=jnp.float32)
    y = y + b2_ref[...]
    o_ref[...] = y.astype(o_ref.dtype)


@functools.partial(jax.jit, static_argnames=("out_dim", "tm"))
def _mlp_forward(x, w1_t, b1, w2_t, b2, *, out_dim, tm):
    batch, in_dim = x.shape
    in_p, hid_p = w1_t.shape
    out_p = w2_t.shape[1]
    batch_p = _round_up(batch, tm)

    # Zero-pad + bf16-cast the activations once so every block is
    # (8, 128)-aligned; padded columns hit zero weight rows, so results match.
    x_p = jnp.zeros((batch_p, in_p), jnp.bfloat16)
    x_p = x_p.at[:batch, :in_dim].set(x.astype(jnp.bfloat16))

    grid = (batch_p // tm,)

    flops = 2 * batch_p * (in_p * hid_p + hid_p * out_p)
    bytes_accessed = (x_p.size * 2            # bf16 activations in
                      + w1_t.size * 2 + w2_t.size * 2   # bf16 weights
                      + b1.size * 4 + b2.size * 4        # f32 biases
                      + batch_p * out_p * 4)             # f32 output

    out = pl.pallas_call(
        _mlp_kernel,
        out_shape=jax.ShapeDtypeStruct((batch_p, out_p), jnp.float32),
        grid_spec=pltpu.PrefetchScalarGridSpec(
            num_scalar_prefetch=0,
            grid=grid,
            in_specs=[
                pl.BlockSpec((tm, in_p), lambda i: (i, 0)),     # x: batch-tiled
                pl.BlockSpec((in_p, hid_p), lambda i: (0, 0)),  # W1: resident
                pl.BlockSpec((1, hid_p), lambda i: (0, 0)),     # b1: resident
                pl.BlockSpec((hid_p, out_p), lambda i: (0, 0)), # W2: resident
                pl.BlockSpec((1, out_p), lambda i: (0, 0)),     # b2: resident
            ],
            out_specs=pl.BlockSpec((tm, out_p), lambda i: (i, 0)),
        ),
        compiler_params=pltpu.CompilerParams(
            dimension_semantics=("parallel",),   # batch tiles -> both TCs on v7x
        ),
        cost_estimate=pl.CostEstimate(
            flops=flops, transcendentals=0, bytes_accessed=bytes_accessed),
    )(x_p, w1_t, b1, w2_t, b2)

    # Slice back to the caller-visible shape (lane-dense inside the kernel).
    return out[:batch, :out_dim]


class FineTuningModelSubNetv2:
    """JAX/Pallas port of the PyTorch FineTuningModelSubNetv2 module."""

    # Feature dims are padded to multiples of this at init (vreg lane width /
    # MXU tile). Keeps the MXU N/K dims dense and the output stores unmasked.
    _LANE = 128
    # Max rows per grid step. Small enough to fit comfortably in v7x's 64 MiB
    # VMEM even with double buffering (x tile + out tile + weights << 1 MiB).
    _MAX_TM = 256

    def __init__(self, input_dim, hidden_dim, output_dims, key):
        self.input_dim = input_dim
        self.hidden_dim = hidden_dim
        in_p = _round_up(input_dim, self._LANE)
        hid_p = _round_up(hidden_dim, self._LANE)

        self.params = {}
        for output_dim in output_dims:
            out_p = _round_up(output_dim, self._LANE)
            key, k1, k2, k3, k4 = jax.random.split(key, 5)
            # PyTorch nn.Linear default init: U(-1/sqrt(fan_in), 1/sqrt(fan_in))
            bound1 = 1.0 / jnp.sqrt(input_dim)
            bound2 = 1.0 / jnp.sqrt(hidden_dim)
            w1 = jax.random.uniform(k1, (hidden_dim, input_dim),
                                    minval=-bound1, maxval=bound1,
                                    dtype=jnp.float32)
            b1 = jax.random.uniform(k2, (hidden_dim,),
                                    minval=-bound1, maxval=bound1,
                                    dtype=jnp.float32)
            w2 = jax.random.uniform(k3, (output_dim, hidden_dim),
                                    minval=-bound2, maxval=bound2,
                                    dtype=jnp.float32)
            b2 = jax.random.uniform(k4, (output_dim,),
                                    minval=-bound2, maxval=bound2,
                                    dtype=jnp.float32)

            # Pre-transpose, zero-pad to lane multiples, and cast the matmul
            # operands to bf16 once at init. Biases stay f32 (and padded with
            # zeros so padded hidden/output lanes contribute nothing).
            w1_t = jnp.zeros((in_p, hid_p), jnp.bfloat16)
            w1_t = w1_t.at[:input_dim, :hidden_dim].set(w1.T.astype(jnp.bfloat16))
            b1_p = jnp.zeros((1, hid_p), jnp.float32)
            b1_p = b1_p.at[0, :hidden_dim].set(b1)
            w2_t = jnp.zeros((hid_p, out_p), jnp.bfloat16)
            w2_t = w2_t.at[:hidden_dim, :output_dim].set(w2.T.astype(jnp.bfloat16))
            b2_p = jnp.zeros((1, out_p), jnp.float32)
            b2_p = b2_p.at[0, :output_dim].set(b2)

            self.params[str(output_dim)] = dict(
                w1_t=w1_t, b1=b1_p, w2_t=w2_t, b2=b2_p,
                out_dim=output_dim,
            )

    def __call__(self, input_data, output_dim):
        p = self.params[str(output_dim)]
        batch = input_data.shape[0]
        tm = min(self._MAX_TM, _round_up(batch, 8))
        return _mlp_forward(input_data, p["w1_t"], p["b1"], p["w2_t"], p["b2"],
                            out_dim=p["out_dim"], tm=tm)


if __name__ == "__main__":
    key = jax.random.PRNGKey(0)
    key, xkey, mkey = jax.random.split(key, 3)

    batch = 8
    input_dim = 32
    hidden_dim = 32
    output_dims = [8, 16]

    model = FineTuningModelSubNetv2(input_dim, hidden_dim, output_dims, mkey)

    x = jax.random.normal(xkey, (batch, input_dim), dtype=jnp.float32)

    ok = True
    for od in output_dims:
        y = model(x, od)
        y = jax.block_until_ready(y)

        # Pure-JAX reference doing the same math the kernel does (bf16 matmul
        # operands, f32 accumulation / bias adds), using the padded params.
        p = model.params[str(od)]
        in_p = p["w1_t"].shape[0]
        w1f = p["w1_t"].astype(jnp.float32)
        w2f = p["w2_t"].astype(jnp.float32)
        x_p = jnp.zeros((batch, in_p), jnp.float32)
        x_p = x_p.at[:, :input_dim].set(
            x.astype(jnp.bfloat16).astype(jnp.float32))
        h = x_p @ w1f + p["b1"]
        h = h.astype(jnp.bfloat16).astype(jnp.float32)
        y_ref = (h @ w2f + p["b2"])[:, :od]

        if y.shape != (batch, od):
            ok = False
        if not jnp.allclose(y, y_ref, atol=1e-4, rtol=1e-4):
            ok = False

    if ok:
        print("KERNEL_OK")
</pallas_src>

<mosaic_0001>
module attributes {stable_mosaic.version = 11 : i64} {
  func.func @_mlp_kernel(%arg0: i32, %arg1: memref<8x128xbf16, #tpu.memory_space<vmem>>, %arg2: memref<128x128xbf16, #tpu.memory_space<vmem>>, %arg3: memref<1x128xf32, #tpu.memory_space<vmem>>, %arg4: memref<128x128xbf16, #tpu.memory_space<vmem>>, %arg5: memref<1x128xf32, #tpu.memory_space<vmem>>, %arg6: memref<8x128xf32, #tpu.memory_space<vmem>>) attributes {dimension_semantics = [#tpu.dimension_semantics<parallel>], iteration_bounds = array<i64: 1>, scalar_prefetch = 0 : i64, scratch_operands = 0 : i64, tpu.core_type = #tpu.core_type<tc>, window_params = [{transform_indices = @transform_0, window_bounds = array<i64: 8, 128>}, {pipeline_mode = #tpu.pipeline_mode<synchronous>, transform_indices = @transform_1, window_bounds = array<i64: 128, 128>}, {pipeline_mode = #tpu.pipeline_mode<synchronous>, transform_indices = @transform_2, window_bounds = array<i64: 1, 128>}, {pipeline_mode = #tpu.pipeline_mode<synchronous>, transform_indices = @transform_3, window_bounds = array<i64: 128, 128>}, {pipeline_mode = #tpu.pipeline_mode<synchronous>, transform_indices = @transform_4, window_bounds = array<i64: 1, 128>}, {transform_indices = @transform_5, window_bounds = array<i64: 8, 128>}]} {
    %c0 = arith.constant 0 : index
    %c0_0 = arith.constant 0 : index
    %0 = vector.load %arg1[%c0, %c0_0] : memref<8x128xbf16, #tpu.memory_space<vmem>>, vector<8x128xbf16>
    %c0_1 = arith.constant 0 : index
    %c0_2 = arith.constant 0 : index
    %1 = vector.load %arg2[%c0_1, %c0_2] : memref<128x128xbf16, #tpu.memory_space<vmem>>, vector<128x128xbf16>
    %cst = arith.constant dense<0.000000e+00> : vector<8x128xf32>
    %2 = tpu.matmul %0, %1, %cst {dimension_numbers = #tpu.dot_dimension_numbers<[1], [0], [0], [1], [0, 0, 1, 1], [], []>} : vector<8x128xbf16>, vector<128x128xbf16>, vector<8x128xf32> -> vector<8x128xf32>
    %c0_3 = arith.constant 0 : index
    %c0_4 = arith.constant 0 : index
    %3 = vector.load %arg3[%c0_3, %c0_4] : memref<1x128xf32, #tpu.memory_space<vmem>>, vector<1x128xf32>
    %4 = vector.broadcast %3 : vector<1x128xf32> to vector<8x128xf32>
    %5 = arith.addf %2, %4 : vector<8x128xf32>
    %6 = arith.truncf %5 : vector<8x128xf32> to vector<8x128xbf16>
    %c0_5 = arith.constant 0 : index
    %c0_6 = arith.constant 0 : index
    %7 = vector.load %arg4[%c0_5, %c0_6] : memref<128x128xbf16, #tpu.memory_space<vmem>>, vector<128x128xbf16>
    %cst_7 = arith.constant dense<0.000000e+00> : vector<8x128xf32>
    %8 = tpu.matmul %6, %7, %cst_7 {dimension_numbers = #tpu.dot_dimension_numbers<[1], [0], [0], [1], [0, 0, 1, 1], [], []>} : vector<8x128xbf16>, vector<128x128xbf16>, vector<8x128xf32> -> vector<8x128xf32>
    %c0_8 = arith.constant 0 : index
    %c0_9 = arith.constant 0 : index
    %9 = vector.load %arg5[%c0_8, %c0_9] : memref<1x128xf32, #tpu.memory_space<vmem>>, vector<1x128xf32>
    %10 = vector.broadcast %9 : vector<1x128xf32> to vector<8x128xf32>
    %11 = arith.addf %8, %10 : vector<8x128xf32>
    %c0_10 = arith.constant 0 : index
    %c0_11 = arith.constant 0 : index
    %12 = vector.load %arg6[%c0_10, %c0_11] : memref<8x128xf32, #tpu.memory_space<vmem>>, vector<8x128xf32>
    tpu.vector_store %arg6[%c0_10, %c0_11], %11 {strides = array<i32>} : memref<8x128xf32, #tpu.memory_space<vmem>>, vector<8x128xf32>,
    return
  }
  func.func @transform_0(%arg0: i32) -> (i32, i32) {
    %c0_i32 = arith.constant 0 : i32
    %c0_i32_0 = arith.constant 0 : i32
    return %arg0, %c0_i32 : i32, i32
  }
  func.func @transform_1(%arg0: i32) -> (i32, i32) {
    %c0_i32 = arith.constant 0 : i32
    %c0_i32_0 = arith.constant 0 : i32
    %c0_i32_1 = arith.constant 0 : i32
    return %c0_i32, %c0_i32_0 : i32, i32
  }
  func.func @transform_2(%arg0: i32) -> (i32, i32) {
    %c0_i32 = arith.constant 0 : i32
    %c0_i32_0 = arith.constant 0 : i32
    %c0_i32_1 = arith.constant 0 : i32
    return %c0_i32, %c0_i32_0 : i32, i32
  }
  func.func @transform_3(%arg0: i32) -> (i32, i32) {
    %c0_i32 = arith.constant 0 : i32
    %c0_i32_0 = arith.constant 0 : i32
    %c0_i32_1 = arith.constant 0 : i32
    return %c0_i32, %c0_i32_0 : i32, i32
  }
  func.func @transform_4(%arg0: i32) -> (i32, i32) {
    %c0_i32 = arith.constant 0 : i32
    %c0_i32_0 = arith.constant 0 : i32
    %c0_i32_1 = arith.constant 0 : i32
    return %c0_i32, %c0_i32_0 : i32, i32
  }
  func.func @transform_5(%arg0: i32) -> (i32, i32) {
    %c0_i32 = arith.constant 0 : i32
    %c0_i32_0 = arith.constant 0 : i32
    return %arg0, %c0_i32 : i32, i32
  }
}

</mosaic_0001>

<bundles_post_ra>
// kernel: _mlp_forward.1
= control target key start
LH: loop header
LB: loop body
LE: loop exit
PB: predicated region body
PF: predicated region fallthrough
CT: control target
= control target key end

     0   :  { %10 = vsyncpa [#allocation3], 0  ;;  %s454_s0 = inlined_call_operand.vmem [shape: bf16[8,128], index: 0, kind: input, shape index: {}]   ;;  %s455_s1 = inlined_call_operand.hbm [shape: bf16[128,128], index: 1, kind: input, shape index: {}]   ;;  %s456_s2 = inlined_call_operand.vmem [shape: f32[1,128], index: 2, kind: input, shape index: {}]   ;;  %s457_s3 = inlined_call_operand.hbm [shape: bf16[128,128], index: 3, kind: input, shape index: {}]   ;;  %s458_s4 = inlined_call_operand.vmem [shape: f32[1,128], index: 4, kind: input, shape index: {}]   ;;  %s459_s5 = inlined_call_operand.hbm [shape: f32[8,128], index: 5, kind: output, shape index: {}]  }
   0x1   :  { %11 = vsyncpa [#allocation6], 0 }
   0x2   :  { %12 = vsyncpa [#allocation4], 0  ;;  %s19_s20 = sshll.u32 %s455_s1, 4  ;;  %s401_s21 = smov [#allocation2]   ;;  %s20_s20 = int_to_ptr.hbm [resolvable:$true] %s19_s20 }
   0x3   :  { %s21_s22 = sshll.u32 %s401_s21, 4  ;;  %s34_s25 = sshll.u32 %s457_s3, 4  ;;  %s22_s22 = int_to_ptr.vmem [resolvable:$true] %s21_s22  ;;  %s35_s25 = int_to_ptr.hbm [resolvable:$true] %s34_s25 }
   0x4   :  { %s402_s26 = smov 64   ;;  %s403_s27 = smov 4  }
   0x5   :  { %27 = dma.hbm_to_vmem [thread:$0]  %s20_s20, 1024, %s22_s22, [#allocation3], %s402_s26, %s402_s26, %s403_s27  }
   0x6   :  { %s404_s28 = smov [#allocation5]  }
   0x7   :  { %s36_s29 = sshll.u32 %s404_s28, 4  ;;  %s37_s29 = int_to_ptr.vmem [resolvable:$true] %s36_s29 }
   0x8   :  { %42 = dma.hbm_to_vmem [thread:$0]  %s35_s25, 1024, %s37_s29, [#allocation6], %s402_s26, %s402_s26, %s403_s27  }
   0x9   :  { %395 = dma.done.wait [#allocation3], 1024  }
   0xa   :  { %396 = vsyncadd [#allocation3], 4294966272 }
   0xb   :  { %397 = dma.done.wait [#allocation6], 1024  }
   0xc   :  { %398 = vsyncadd [#allocation6], 4294966272  ;;  %v307_v0 = vld [vmem:[#allocation2 + $0x38] sm:$0xff]  ;;  %v306_v1 = vld [vmem:[#allocation2 + $0x30] sm:$0xff]  ;;  %s405_s9 = smov [#allocation7]   ;;  %s225_s12 = sshll.u32 %s459_s5, 4  ;;  %s226_s12 = int_to_ptr.hbm [resolvable:$true] %s225_s12 }
   0xd   :  { %122 = vmatpush.bf16.msra.mxu0 %v307_v0  ;;  %v315_v2 = vld [vmem:[#allocation5 + $0x38] sm:$0xff]  ;;  %v314_v3 = vld [vmem:[#allocation5 + $0x30] sm:$0xff]  ;;  %v305_v4 = vld [vmem:[#allocation2 + $0x28] sm:$0xff]  ;;  %s223_s10 = sshll.u32 %s405_s9, 4  ;;  %s224_s10 = int_to_ptr.vmem [resolvable:$true] %s223_s10 }
   0xe   :  { %204 = vmatpush.bf16.msra.mxu1 %v315_v2  ;;  %v313_v5 = vld [vmem:[#allocation5 + $0x28] sm:$0xff]  ;;  %v304_v6 = vld [vmem:[#allocation2 + $0x20] sm:$0xff]  ;;  %v303_v8 = vld [vmem:[#allocation2 + $0x18] sm:$0xff] }
   0xf   :  { %v312_v7 = vld [vmem:[#allocation5 + $0x20] sm:$0xff]  ;;  %v311_v9 = vld [vmem:[#allocation5 + $0x18] sm:$0xff]  ;;  %v302_v10 = vld [vmem:[#allocation2 + $0x10] sm:$0xff] }
  0x10   :  { %v310_v11 = vld [vmem:[#allocation5 + $0x10] sm:$0xff]  ;;  %v301_v12 = vld [vmem:[#allocation2 + $0x8] sm:$0xff]  ;;  %v300_v14 = vld [vmem:[#allocation2] sm:$0xff] }
  0x11   :  { %123 = vmatpush.bf16.msra.mxu0 %v306_v1  ;;  %v309_v13 = vld [vmem:[#allocation5 + $0x8] sm:$0xff]  ;;  %v53_v15 = vld [vmem:[%s454_s0] sm:$0xf] }
  0x12   :  { %205 = vmatpush.bf16.msra.mxu1 %v314_v3  ;;  %v308_v16 = vld [vmem:[#allocation5] sm:$0xff] }
  0x13   :  { %v321_v17 = vld [vmem:[%s456_s2] ss:$0 sm:$0xff] }
  0x14   :  { %v322_v22 = vld [vmem:[%s458_s4] ss:$0 sm:$0xff] }
  0x15   :  { %124 = vmatpush.bf16.msra.mxu0 %v305_v4 }
  0x16   :  { %206 = vmatpush.bf16.msra.mxu1 %v313_v5 }
  0x19   :  { %125 = vmatpush.bf16.msra.mxu0 %v304_v6 }
  0x1a   :  { %207 = vmatpush.bf16.msra.mxu1 %v312_v7 }
  0x1d   :  { %126 = vmatpush.bf16.msra.mxu0 %v303_v8 }
  0x1e   :  { %208 = vmatpush.bf16.msra.mxu1 %v311_v9 }
  0x21   :  { %127 = vmatpush.bf16.msra.mxu0 %v302_v10 }
  0x22   :  { %209 = vmatpush.bf16.msra.mxu1 %v310_v11 }
  0x25   :  { %128 = vmatpush.bf16.msra.mxu0 %v301_v12 }
  0x26   :  { %210 = vmatpush.bf16.msra.mxu1 %v309_v13 }
  0x29   :  { %129 = vmatpush.bf16.msra.mxu0 %v300_v14 }
  0x2a   :  { %211 = vmatpush.bf16.msra.mxu1 %v308_v16 }
  0x2c   :  { %130 = vmatmul.bf16.vlgmr.msra.gmra.mxu0 %v53_v15 }
  0xa9   :  { %v131_v18 = vpop.f32.mrf.mxu0 }
  0xaa   :  { %v132_v19 = vadd.f32 %v321_v17, %v131_v18 }
  0xac   :  { %v135_v20 = vpack.c.bf16 %v132_v19, %v132_v19 }
  0xae   :  { %212 = vmatmul.bf16.vlgmr.msra.gmra.mxu1 %v135_v20 }
  0xb1   :  { %v133_v21 = vpop.f32.mrf.mxu0 }
 0x12b   :  { %v213_v23 = vpop.f32.mrf.mxu1 }
 0x12c   :  { %v214_v24 = vadd.f32 %v322_v22, %v213_v23 }
 0x12e   :  { %217 = vst [vmem:[#allocation7] sm:$0xff] %v214_v24 }
 0x12f   :  { %228 = dma.vmem_to_hbm [thread:$0]  %s224_s10, 128, %s226_s12, [#allocation4]  }
 0x133   :  { %v215_v25 = vpop.f32.mrf.mxu1 }
 0x134   :  { %399 = dma.done.wait [#allocation4], 128  }
 0x135   :  { %400 = vsyncadd [#allocation4], 4294967168 }
 0x136   :  { %233 = vsyncpa [#allocation3], 1 }
 0x137   :  { %234 = vsyncpa [#allocation6], 1 }
 0x138   :  { %235 = vsyncpa [#allocation4], 1 }

</bundles_post_ra>
